<compile_context>
chip_gen: v5e
topology: v5e:2x2
jax: 0.10.0
libtpu: 0.0.40
codegen_flags: <defaults>
</compile_context>

<pallas_src>
import functools

import jax
import jax.numpy as jnp
from jax import lax
from jax.experimental import pallas as pl
from jax.experimental.pallas import tpu as pltpu

FILTERS = 32   # GConvGRU out_channels


def _gconv_gru_kernel(e_ref, x_ref, wcat_ref, vecs_ref, o_ref):
    """One block of Bb independent graph snapshots.

    e_ref    : (Bb, 3, Ep)        f32   rows = [src, dst, weight]; padded edges have w = 0
    x_ref    : (Bb, N, F)         bf16  node features
    wcat_ref : (F, 4*FILTERS)     bf16  [Wz0 | Wh0 | Wz1 | Wh1]
    vecs_ref : (4, FILTERS)       f32   [b_z, b_h, w_lin, b_lin broadcast]
    o_ref    : (Bb, N)            f32   per-node scalar output (lane-dense)
    """
    Bb, N, F = x_ref.shape
    C = FILTERS
    Ep = e_ref.shape[2]

    # ---------- build the scaled Chebyshev operator pieces in-kernel ----------
    edges = e_ref[...]
    src = edges[:, 0:1, :]                                   # (Bb, 1, Ep)
    dst = edges[:, 1:2, :]                                   # (Bb, 1, Ep)
    w = jnp.where(src == dst, 0.0, edges[:, 2:3, :])         # remove self-loops

    node = lax.broadcasted_iota(jnp.int32, (Bb, N, Ep), 1).astype(jnp.float32)
    oh_src_w = jnp.where(node == src, w, 0.0)                # (Bb, N, Ep): w at [src[e], e]
    oh_dst = (node == dst).astype(jnp.float32)               # (Bb, N, Ep)

    # adj[b, d, s] = sum_e 1[dst[e]==d] * w[e] * 1[src[e]==s]   (dup edges summed)
    adj = jnp.einsum('bde,bse->bds', oh_dst, oh_src_w,
                     preferred_element_type=jnp.float32)     # (Bb, N, N)
    # deg[s] = scatter_add(w, src)  (every real edge hits exactly one dst node)
    deg = jnp.sum(oh_src_w, axis=2, keepdims=True)           # (Bb, N, 1)
    dinv = jnp.where(deg > 0.0, lax.rsqrt(deg), 0.0)         # (Bb, N, 1)

    # ---------- one lane-dense MXU pass for all four ChebConv weights ---------
    X2 = x_ref[...].reshape(Bb * N, F)                        # (Bb*N, F) bf16
    XW = jnp.dot(X2, wcat_ref[...],
                 preferred_element_type=jnp.float32)          # (Bb*N, 4C) f32
    XW = XW.reshape(Bb, N, 4 * C)

    # T1 = L_hat @ (X @ [Wz1 | Wh1]),  L_hat = -D^-1/2 A D^-1/2
    XW1 = XW[:, :, 2 * C:4 * C]                               # (Bb, N, 2C)
    T1 = -(dinv * jnp.einsum('bds,bsf->bdf', adj, dinv * XW1,
                             preferred_element_type=jnp.float32))

    V = vecs_ref[...]                                         # (4, C)
    pre_z = XW[:, :, 0:C] + T1[:, :, 0:C] + V[0:1, :]         # update gate pre-act
    pre_h = XW[:, :, C:2 * C] + T1[:, :, C:2 * C] + V[1:2, :] # candidate pre-act

    # sigmoid via single EUP tanh; H0 == 0 so H = (1 - Z) * H_tilde
    Z = 0.5 * (jnp.tanh(0.5 * pre_z) + 1.0)
    H = (1.0 - Z) * jnp.tanh(pre_h)

    # relu + Linear(FILTERS -> 1): VPU multiply + lane reduction (no MXU pass)
    Hr = jnp.maximum(H, 0.0)
    out = jnp.sum(Hr * V[2:3, :], axis=2) + V[3:4, 0:1]       # (Bb, N)
    o_ref[...] = out


def _pack_params(params):
    f32 = jnp.float32
    # [Wz0 | Wh0 | Wz1 | Wh1]  -> single (F, 4*FILTERS) lane-dense tile, bf16 for MXU
    wcat = jnp.concatenate(
        [params["w0_xz"], params["w0_xh"], params["w1_xz"], params["w1_xh"]],
        axis=1).astype(jnp.bfloat16)
    b_z = (params["b_xz"] + params["b_hz"]).astype(f32)   # ChebConv_hz(0) = its bias
    b_h = (params["b_xh"] + params["b_hh"]).astype(f32)   # ChebConv_hh(0) = its bias
    w_lin = params["w_lin"].reshape(-1).astype(f32)
    b_lin = jnp.full((FILTERS,), params["b_lin"].reshape(()).astype(f32), dtype=f32)
    vecs = jnp.stack([b_z, b_h, w_lin, b_lin], axis=0)     # (4, FILTERS)
    return wcat, vecs


def _pack_edges(edge_index, edge_weight, e_pad):
    # edge_index: (B, 2, E) int, edge_weight: (B, E)  ->  (B, 3, e_pad) f32
    f32 = jnp.float32
    src = edge_index[:, 0, :].astype(f32)
    dst = edge_index[:, 1, :].astype(f32)
    w = edge_weight.astype(f32)
    edges = jnp.stack([src, dst, w], axis=1)               # (B, 3, E)
    pad = e_pad - edges.shape[2]
    if pad:
        edges = jnp.pad(edges, ((0, 0), (0, 0), (0, pad)))  # padded edges: w = 0
    return edges


def recurrent_gcn_gconvgru_batched(x, edge_index, edge_weight, params, *, block_b=None):
    """B independent snapshots: x (B,N,F), edge_index (B,2,E) int, edge_weight (B,E).

    Returns (B, N, 1) f32. Single pallas_call, grid over batch blocks, batch axis
    marked "parallel" so both v7x TensorCores are used when B is large.
    """
    B, N, F = x.shape
    E = edge_index.shape[2]
    e_pad = ((E + 127) // 128) * 128
    if block_b is None:
        block_b = B if B <= 8 else 8       # >=8 graphs/block -> (>=128, F) MXU sublanes
    pad_b = (-B) % block_b
    Bp = B + pad_b

    edges = _pack_edges(edge_index, edge_weight, e_pad)     # (B, 3, e_pad) f32
    xb = x.astype(jnp.bfloat16)                             # MXU operand in bf16
    if pad_b:
        edges = jnp.pad(edges, ((0, pad_b), (0, 0), (0, 0)))
        xb = jnp.pad(xb, ((0, pad_b), (0, 0), (0, 0)))

    wcat, vecs = _pack_params(params)

    out = pl.pallas_call(
        _gconv_gru_kernel,
        out_shape=jax.ShapeDtypeStruct((Bp, N), jnp.float32),
        grid=(Bp // block_b,),
        in_specs=[
            pl.BlockSpec((block_b, 3, e_pad), lambda i: (i, 0, 0)),
            pl.BlockSpec((block_b, N, F), lambda i: (i, 0, 0)),
            pl.BlockSpec((F, 4 * FILTERS), lambda i: (0, 0)),   # weights stay resident
            pl.BlockSpec((4, FILTERS), lambda i: (0, 0)),
        ],
        out_specs=pl.BlockSpec((block_b, N), lambda i: (i, 0)),
        compiler_params=pltpu.CompilerParams(
            dimension_semantics=("parallel",)),
    )(edges, xb, wcat, vecs)
    return out[:B].reshape(B, N, 1)


def recurrent_gcn_gconvgru(x, edge_index, edge_weight, params):
    """Single snapshot — same signature/semantics as RecurrentGCN_GConvGRU.forward."""
    out = recurrent_gcn_gconvgru_batched(
        x[None], edge_index[None], edge_weight[None], params)
    return out[0]                                           # (N, 1)


def _init_params(key, node_features, filters=FILTERS):
    ks = jax.random.split(key, 10)
    f32 = jnp.float32

    def glorot(k, shape):
        lim = (6.0 / (shape[0] + shape[1])) ** 0.5
        return jax.random.uniform(k, shape, f32, -lim, lim)

    def small(k, shape):
        return (0.1 * jax.random.normal(k, shape)).astype(f32)

    return {
        # ChebConv(node_features -> filters, K=2): update-gate x-path (conv_x_z)
        "w0_xz": glorot(ks[0], (node_features, filters)),
        "w1_xz": glorot(ks[1], (node_features, filters)),
        "b_xz": small(ks[2], (filters,)),
        # conv_h_z: only its bias matters (its weights multiply the zero hidden state)
        "b_hz": small(ks[3], (filters,)),
        # ChebConv: candidate-state x-path (conv_x_h)
        "w0_xh": glorot(ks[4], (node_features, filters)),
        "w1_xh": glorot(ks[5], (node_features, filters)),
        "b_xh": small(ks[6], (filters,)),
        # conv_h_h: only its bias matters when H0 == 0
        "b_hh": small(ks[7], (filters,)),
        # conv_x_r / conv_h_r (reset gate) omitted: with H0 == 0 they never affect the output
        # final Linear(filters -> 1); weight stored as a (filters,) row
        "w_lin": small(ks[8], (filters,)),
        "b_lin": small(ks[9], (1,)),
    }


if __name__ == "__main__":
    NUM_NODES = 16
    NODE_FEATURES = 4
    NUM_EDGES = 40
    BATCH = 8

    key = jax.random.PRNGKey(0)
    (k_x, k_src, k_dst, k_w, k_p,
     k_bx, k_bs, k_bd, k_bw) = jax.random.split(key, 9)

    # --- single snapshot (module's forward signature) -------------------------
    x = jax.random.normal(k_x, (NUM_NODES, NODE_FEATURES), dtype=jnp.float32)
    edge_index = jnp.stack(
        [jax.random.randint(k_src, (NUM_EDGES,), 0, NUM_NODES),
         jax.random.randint(k_dst, (NUM_EDGES,), 0, NUM_NODES)], axis=0
    ).astype(jnp.int32)
    edge_weight = jax.random.uniform(k_w, (NUM_EDGES,), dtype=jnp.float32) + 0.1

    params = _init_params(k_p, NODE_FEATURES)

    single = jax.jit(functools.partial(recurrent_gcn_gconvgru, params=params))
    out1 = single(x, edge_index, edge_weight)
    jax.block_until_ready(out1)
    assert out1.shape == (NUM_NODES, 1) and out1.dtype == jnp.float32

    # --- batched snapshots: exercises the parallel grid / MXU-shaped matmuls --
    xb = jax.random.normal(k_bx, (BATCH, NUM_NODES, NODE_FEATURES), dtype=jnp.float32)
    eib = jnp.stack(
        [jax.random.randint(k_bs, (BATCH, NUM_EDGES), 0, NUM_NODES),
         jax.random.randint(k_bd, (BATCH, NUM_EDGES), 0, NUM_NODES)], axis=1
    ).astype(jnp.int32)
    ewb = jax.random.uniform(k_bw, (BATCH, NUM_EDGES), dtype=jnp.float32) + 0.1

    batched = jax.jit(functools.partial(recurrent_gcn_gconvgru_batched, params=params))
    outb = batched(xb, eib, ewb)
    jax.block_until_ready(outb)
    assert outb.shape == (BATCH, NUM_NODES, 1) and outb.dtype == jnp.float32

    print("KERNEL_OK")
</pallas_src>

<mosaic_0001>
module attributes {stable_mosaic.version = 11 : i64} {
  func.func @_gconv_gru_kernel(%arg0: i32, %arg1: memref<1x3x128xf32, #tpu.memory_space<vmem>>, %arg2: memref<1x16x4xbf16, #tpu.memory_space<vmem>>, %arg3: memref<4x128xbf16, #tpu.memory_space<vmem>>, %arg4: memref<4x32xf32, #tpu.memory_space<vmem>>, %arg5: memref<1x16xf32, #tpu.memory_space<vmem>>) attributes {dimension_semantics = [#tpu.dimension_semantics<parallel>], iteration_bounds = array<i64: 1>, scalar_prefetch = 0 : i64, scratch_operands = 0 : i64, tpu.core_type = #tpu.core_type<tc>, window_params = [{transform_indices = @transform_0, window_bounds = array<i64: 1, 3, 128>}, {transform_indices = @transform_1, window_bounds = array<i64: 1, 16, 4>}, {pipeline_mode = #tpu.pipeline_mode<synchronous>, transform_indices = @transform_2, window_bounds = array<i64: 4, 128>}, {pipeline_mode = #tpu.pipeline_mode<synchronous>, transform_indices = @transform_3, window_bounds = array<i64: 4, 32>}, {transform_indices = @transform_4, window_bounds = array<i64: 1, 16>}]} {
    %c0 = arith.constant 0 : index
    %c0_0 = arith.constant 0 : index
    %c0_1 = arith.constant 0 : index
    %0 = vector.load %arg1[%c0, %c0_0, %c0_1] : memref<1x3x128xf32, #tpu.memory_space<vmem>>, vector<1x3x128xf32>
    %1 = vector.extract_strided_slice %0 {offsets = [0, 0, 0], sizes = [1, 1, 128], strides = [1, 1, 1]} : vector<1x3x128xf32> to vector<1x1x128xf32>
    %2 = vector.extract_strided_slice %0 {offsets = [0, 1, 0], sizes = [1, 1, 128], strides = [1, 1, 1]} : vector<1x3x128xf32> to vector<1x1x128xf32>
    %3 = arith.cmpf oeq, %1, %2 : vector<1x1x128xf32>
    %4 = vector.extract_strided_slice %0 {offsets = [0, 2, 0], sizes = [1, 1, 128], strides = [1, 1, 1]} : vector<1x3x128xf32> to vector<1x1x128xf32>
    %cst = arith.constant 0.000000e+00 : f32
    %5 = vector.broadcast %cst : f32 to vector<1x1x128xf32>
    %6 = arith.select %3, %5, %4 : vector<1x1x128xi1>, vector<1x1x128xf32>
    %7 = tpu.iota {dimensions = array<i32: 1>} : vector<1x16x128xi32>
    %8 = arith.sitofp %7 : vector<1x16x128xi32> to vector<1x16x128xf32>
    %9 = vector.broadcast %1 : vector<1x1x128xf32> to vector<1x16x128xf32>
    %10 = arith.cmpf oeq, %8, %9 : vector<1x16x128xf32>
    %cst_2 = arith.constant 0.000000e+00 : f32
    %11 = vector.shape_cast %6 : vector<1x1x128xf32> to vector<1x1x128xf32>
    %12 = vector.broadcast %11 : vector<1x1x128xf32> to vector<1x16x128xf32>
    %13 = vector.broadcast %cst_2 : f32 to vector<1x16x128xf32>
    %14 = arith.select %10, %12, %13 : vector<1x16x128xi1>, vector<1x16x128xf32>
    %15 = vector.broadcast %2 : vector<1x1x128xf32> to vector<1x16x128xf32>
    %16 = arith.cmpf oeq, %8, %15 : vector<1x16x128xf32>
    %17 = arith.extui %16 : vector<1x16x128xi1> to vector<1x16x128xi32>
    %18 = arith.sitofp %17 : vector<1x16x128xi32> to vector<1x16x128xf32>
    "tpu.trace_start"() <{level = 10 : i32, message = "bde,bse->bds"}> : () -> ()
    %cst_3 = arith.constant dense<0.000000e+00> : vector<1x16x16xf32>
    %19 = tpu.matmul %18, %14, %cst_3 {dimension_numbers = #tpu.dot_dimension_numbers<[2], [2], [1], [1], [0, 0, 0, 1, 1, 1], [0], [0]>} : vector<1x16x128xf32>, vector<1x16x128xf32>, vector<1x16x16xf32> -> vector<1x16x16xf32>
    "tpu.trace_stop"() : () -> ()
    %cst_4 = arith.constant dense<0.000000e+00> : vector<1x16xf32>
    %20 = vector.multi_reduction <add>, %14, %cst_4 [2] : vector<1x16x128xf32> to vector<1x16xf32>
    %21 = vector.shape_cast %20 : vector<1x16xf32> to vector<1x16x1xf32>
    %cst_5 = arith.constant 0.000000e+00 : f32
    %22 = vector.broadcast %cst_5 : f32 to vector<1x16x1xf32>
    %23 = arith.cmpf ogt, %21, %22 : vector<1x16x1xf32>
    %24 = math.rsqrt %21 : vector<1x16x1xf32>
    %cst_6 = arith.constant 0.000000e+00 : f32
    %25 = vector.broadcast %cst_6 : f32 to vector<1x16x1xf32>
    %26 = arith.select %23, %24, %25 : vector<1x16x1xi1>, vector<1x16x1xf32>
    %c0_7 = arith.constant 0 : index
    %c0_8 = arith.constant 0 : index
    %c0_9 = arith.constant 0 : index
    %27 = vector.load %arg2[%c0_7, %c0_8, %c0_9] : memref<1x16x4xbf16, #tpu.memory_space<vmem>>, vector<1x16x4xbf16>
    %28 = vector.shape_cast %27 : vector<1x16x4xbf16> to vector<16x4xbf16>
    %c0_10 = arith.constant 0 : index
    %c0_11 = arith.constant 0 : index
    %29 = vector.load %arg3[%c0_10, %c0_11] : memref<4x128xbf16, #tpu.memory_space<vmem>>, vector<4x128xbf16>
    %cst_12 = arith.constant dense<0.000000e+00> : vector<16x128xf32>
    %30 = tpu.matmul %28, %29, %cst_12 {dimension_numbers = #tpu.dot_dimension_numbers<[1], [0], [0], [1], [0, 0, 1, 1], [], []>} : vector<16x4xbf16>, vector<4x128xbf16>, vector<16x128xf32> -> vector<16x128xf32>
    %31 = vector.shape_cast %30 : vector<16x128xf32> to vector<1x16x128xf32>
    %32 = vector.extract_strided_slice %31 {offsets = [0, 0, 64], sizes = [1, 16, 64], strides = [1, 1, 1]} : vector<1x16x128xf32> to vector<1x16x64xf32>
    %33 = vector.broadcast %26 : vector<1x16x1xf32> to vector<1x16x64xf32>
    %34 = arith.mulf %33, %32 : vector<1x16x64xf32>
    "tpu.trace_start"() <{level = 10 : i32, message = "bds,bsf->bdf"}> : () -> ()
    %cst_13 = arith.constant dense<0.000000e+00> : vector<1x16x64xf32>
    %35 = tpu.matmul %19, %34, %cst_13 {dimension_numbers = #tpu.dot_dimension_numbers<[2], [1], [1], [2], [0, 0, 0, 1, 1, 2], [0], [0]>} : vector<1x16x16xf32>, vector<1x16x64xf32>, vector<1x16x64xf32> -> vector<1x16x64xf32>
    "tpu.trace_stop"() : () -> ()
    %36 = vector.broadcast %26 : vector<1x16x1xf32> to vector<1x16x64xf32>
    %37 = arith.mulf %36, %35 : vector<1x16x64xf32>
    %cst_14 = arith.constant 0.000000e+00 : f32
    %38 = vector.broadcast %cst_14 : f32 to vector<1x16x64xf32>
    %39 = arith.subf %38, %37 : vector<1x16x64xf32>
    %c0_15 = arith.constant 0 : index
    %c0_16 = arith.constant 0 : index
    %40 = vector.load %arg4[%c0_15, %c0_16] : memref<4x32xf32, #tpu.memory_space<vmem>>, vector<4x32xf32>
    %41 = vector.extract_strided_slice %31 {offsets = [0, 0, 0], sizes = [1, 16, 32], strides = [1, 1, 1]} : vector<1x16x128xf32> to vector<1x16x32xf32>
    %42 = vector.extract_strided_slice %39 {offsets = [0, 0, 0], sizes = [1, 16, 32], strides = [1, 1, 1]} : vector<1x16x64xf32> to vector<1x16x32xf32>
    %43 = arith.addf %41, %42 : vector<1x16x32xf32>
    %44 = vector.extract_strided_slice %40 {offsets = [0, 0], sizes = [1, 32], strides = [1, 1]} : vector<4x32xf32> to vector<1x32xf32>
    %45 = vector.shape_cast %44 : vector<1x32xf32> to vector<1x1x32xf32>
    %46 = vector.broadcast %45 : vector<1x1x32xf32> to vector<1x16x32xf32>
    %47 = arith.addf %43, %46 : vector<1x16x32xf32>
    %48 = vector.extract_strided_slice %31 {offsets = [0, 0, 32], sizes = [1, 16, 32], strides = [1, 1, 1]} : vector<1x16x128xf32> to vector<1x16x32xf32>
    %49 = vector.extract_strided_slice %39 {offsets = [0, 0, 32], sizes = [1, 16, 32], strides = [1, 1, 1]} : vector<1x16x64xf32> to vector<1x16x32xf32>
    %50 = arith.addf %48, %49 : vector<1x16x32xf32>
    %51 = vector.extract_strided_slice %40 {offsets = [1, 0], sizes = [1, 32], strides = [1, 1]} : vector<4x32xf32> to vector<1x32xf32>
    %52 = vector.shape_cast %51 : vector<1x32xf32> to vector<1x1x32xf32>
    %53 = vector.broadcast %52 : vector<1x1x32xf32> to vector<1x16x32xf32>
    %54 = arith.addf %50, %53 : vector<1x16x32xf32>
    %cst_17 = arith.constant 5.000000e-01 : f32
    %55 = vector.broadcast %cst_17 : f32 to vector<1x16x32xf32>
    %56 = arith.mulf %55, %47 : vector<1x16x32xf32>
    %57 = math.tanh %56 : vector<1x16x32xf32>
    %cst_18 = arith.constant 1.000000e+00 : f32
    %58 = vector.broadcast %cst_18 : f32 to vector<1x16x32xf32>
    %59 = arith.addf %57, %58 : vector<1x16x32xf32>
    %cst_19 = arith.constant 5.000000e-01 : f32
    %60 = vector.broadcast %cst_19 : f32 to vector<1x16x32xf32>
    %61 = arith.mulf %60, %59 : vector<1x16x32xf32>
    %cst_20 = arith.constant 1.000000e+00 : f32
    %62 = vector.broadcast %cst_20 : f32 to vector<1x16x32xf32>
    %63 = arith.subf %62, %61 : vector<1x16x32xf32>
    %64 = math.tanh %54 : vector<1x16x32xf32>
    %65 = arith.mulf %63, %64 : vector<1x16x32xf32>
    %cst_21 = arith.constant 0.000000e+00 : f32
    %66 = vector.broadcast %cst_21 : f32 to vector<1x16x32xf32>
    %67 = arith.maximumf %65, %66 : vector<1x16x32xf32>
    %68 = vector.extract_strided_slice %40 {offsets = [2, 0], sizes = [1, 32], strides = [1, 1]} : vector<4x32xf32> to vector<1x32xf32>
    %69 = vector.shape_cast %68 : vector<1x32xf32> to vector<1x1x32xf32>
    %70 = vector.broadcast %69 : vector<1x1x32xf32> to vector<1x16x32xf32>
    %71 = arith.mulf %67, %70 : vector<1x16x32xf32>
    %cst_22 = arith.constant dense<0.000000e+00> : vector<1x16xf32>
    %72 = vector.multi_reduction <add>, %71, %cst_22 [2] : vector<1x16x32xf32> to vector<1x16xf32>
    %73 = vector.extract_strided_slice %40 {offsets = [3, 0], sizes = [1, 1], strides = [1, 1]} : vector<4x32xf32> to vector<1x1xf32>
    %74 = vector.broadcast %73 : vector<1x1xf32> to vector<1x16xf32>
    %75 = arith.addf %72, %74 : vector<1x16xf32>
    %c0_23 = arith.constant 0 : index
    %c0_24 = arith.constant 0 : index
    %76 = vector.load %arg5[%c0_23, %c0_24] : memref<1x16xf32, #tpu.memory_space<vmem>>, vector<1x16xf32>
    tpu.vector_store %arg5[%c0_23, %c0_24], %75 {strides = array<i32>} : memref<1x16xf32, #tpu.memory_space<vmem>>, vector<1x16xf32>,
    return
  }
  func.func @transform_0(%arg0: i32) -> (i32, i32, i32) {
    %c0_i32 = arith.constant 0 : i32
    %c0_i32_0 = arith.constant 0 : i32
    %c0_i32_1 = arith.constant 0 : i32
    return %arg0, %c0_i32, %c0_i32_0 : i32, i32, i32
  }
  func.func @transform_1(%arg0: i32) -> (i32, i32, i32) {
    %c0_i32 = arith.constant 0 : i32
    %c0_i32_0 = arith.constant 0 : i32
    %c0_i32_1 = arith.constant 0 : i32
    return %arg0, %c0_i32, %c0_i32_0 : i32, i32, i32
  }
  func.func @transform_2(%arg0: i32) -> (i32, i32) {
    %c0_i32 = arith.constant 0 : i32
    %c0_i32_0 = arith.constant 0 : i32
    %c0_i32_1 = arith.constant 0 : i32
    return %c0_i32, %c0_i32_0 : i32, i32
  }
  func.func @transform_3(%arg0: i32) -> (i32, i32) {
    %c0_i32 = arith.constant 0 : i32
    %c0_i32_0 = arith.constant 0 : i32
    %c0_i32_1 = arith.constant 0 : i32
    return %c0_i32, %c0_i32_0 : i32, i32
  }
  func.func @transform_4(%arg0: i32) -> (i32, i32) {
    %c0_i32 = arith.constant 0 : i32
    %c0_i32_0 = arith.constant 0 : i32
    return %arg0, %c0_i32 : i32, i32
  }
}

</mosaic_0001>

<bundles_post_ra>
// kernel: recurrent_gcn_gconvgru.1
= control target key start
LH: loop header
LB: loop body
LE: loop exit
PB: predicated region body
PF: predicated region fallthrough
CT: control target
= control target key end

     0   :  { %vm108_vm0 = vcmask 1041408   ;;  %v27_v2 = vlaneseq  ;;  %s380_s0 = inlined_call_operand.vmem [shape: f32[1,3,128], index: 0, kind: input, shape index: {}]   ;;  %s381_s1 = inlined_call_operand.vmem [shape: bf16[1,16,4], index: 1, kind: input, shape index: {}]   ;;  %s382_s2 = inlined_call_operand.vmem [shape: bf16[4,128], index: 2, kind: input, shape index: {}]   ;;  %s383_s3 = inlined_call_operand.vmem [shape: f32[4,32], index: 3, kind: input, shape index: {}]   ;;  %s384_s4 = inlined_call_operand.hbm [shape: f32[1,16], index: 4, kind: output, shape index: {}]  }
   0x1   :  { %v98_v0 = vld [vmem:[%s382_s2] sm:$0x3] }
   0x2   :  { %v19_v1 = vld [vmem:[%s380_s0] sm:$0x7]  ;;  %v110_v3 = vsel %vm108_vm0, %v98_v0, 0 }
   0x3   :  { %v21_v4 = vrot.slane %v19_v1, 1  ;;  %v24_v5 = vrot.slane %v19_v1, 2  ;;  %v272_v6 = vld [vmem:[%s381_s1] sm:$0xff] }
   0x4   :  { %9 = vsyncpa [#allocation3], 0  ;;  %119 = vmatpush.bf16.msra.mxu1 %v110_v3  ;;  %v28_v7 = vshrl.u32 %v27_v2, 7  ;;  %vm104_vm1 = vcmask 31744   ;;  %v32_v10 = vperm.slane %v19_v1, 0  ;;  %v38_v16 = vperm.slane %v19_v1, 1 }
   0x5   :  { %vm23_vm2 = vcmp.eq.f32.partialorder %v19_v1, %v21_v4  ;;  %v326_v17 = vmov 1.0   ;;  %s327_s0 = smov 64   ;;  %v370_v41 = vld [vmem:[%s383_s3] sm:$0xf]  ;;  %s328_s21 = smov 32   ;;  %vm136_vm15 = vcmask 130048  }
   0x6   :  { %v26_v8 = vsel %vm23_vm2, 0.0, %v24_v5  ;;  %v29_v9 = vadd.s32 8, %v28_v7  ;;  %v30_v13 = vcvt.s32.f32 %v28_v7  ;;  %v176_v42 = vperm.slane %v370_v41, 1  ;;  %s329_s3 = smov 96   ;;  %s331_s22 = smov [#allocation2]  }
   0x7   :  { %v35_v11 = vperm.slane %v26_v8, 0  ;;  %269 = vmatmul.msk.bf16.vlgmr.msra.gmra.mxu1 %vm104_vm1, %v272_v6  ;;  %v173_v61 = vperm.slane %v370_v41, 0  ;;  %v330_v62 = vmov 0   ;;  %vm210_vm0 = vcmask 261120   ;;  %s248_s23 = sshll.u32 %s331_s22, 4  ;;  %s250_s26 = sshll.u32 %s384_s4, 4  ;;  %s249_s23 = int_to_ptr.vmem [resolvable:$true] %s248_s23  ;;  %s251_s26 = int_to_ptr.hbm [resolvable:$true] %s250_s26 }
   0x8   :  { %v31_v12 = vcvt.s32.f32 %v29_v9  ;;  %vm33_vm4 = vcmp.eq.f32.partialorder %v30_v13, %v32_v10  ;;  %vm39_vm5 = vcmp.eq.f32.partialorder %v30_v13, %v38_v16  ;;  %286 = vset.pattern.permute.xlu0 %v330_v62  ;;  %287 = vset.pattern.permute.xlu2 %v330_v62  ;;  %vm238_vm1 = vcmask 130112  }
   0x9   :  { %v36_v15 = vsel %vm33_vm4, %v35_v11, 0.0  ;;  %vm241_vm2 = vcmask 122880  }
   0xa   :  { %vm34_vm3 = vcmp.eq.f32.partialorder %v31_v12, %v32_v10  ;;  %vm40_vm6 = vcmp.eq.f32.partialorder %v31_v12, %v38_v16  ;;  %v207_v12 = vperm.slane %v370_v41, 2 }
   0xb   :  { %v37_v14 = vsel %vm34_vm3, %v35_v11, 0.0  ;;  %261 = vmatpush.xpose.msk.msra.mxu0 %vm34_vm3, %v35_v11  ;;  %273 = vmatpush.xpose.msk.msra.mxu3 %vm34_vm3, %v35_v11 }
   0xc   :  { %70 = vadd.xlane.f32.xlu0 %v37_v14 }
   0xf   :  { %262 = vmatpush.xpose.msk.msra.mxu0 %vm33_vm4, %v35_v11  ;;  %274 = vmatpush.xpose.msk.msra.mxu3 %vm33_vm4, %v35_v11 }
  0x12   :  { %263 = vmatmul.msk.f32.vlgmr.msra.gmra.mxu0 %vm39_vm5, %v326_v17  ;;  %264 = vmatmul.msk.f32.vlgmr.msra.gmra.mxu3 %vm40_vm6, %v326_v17 }
  0x14   :  { %68 = vadd.xlane.f32.xlu0 %v36_v15 }
  0x28   :  { %219 = vperm.xlu0 %286, %v370_v41  }
  0x7f   :  { %v71_v18 = vpop.xlane.xlu0 %70 }
  0x80   :  { %288 = vrsqrt.f32 %v71_v18  ;;  %vm90_vm8 = vweird.f32 %v71_v18  ;;  %vm73_vm12 = vcmp.gt.f32.partialorder %v71_v18, 0.0 }
  0x84   :  { %v121_v26 = vpop.f32.mrf.mxu1 }
  0x86   :  { %v289_v19 = vpop.eup %288 }
  0x87   :  { %v85_v20 = vmul.f32 %v289_v19, %v71_v18  ;;  %v69_v21 = vpop.xlane.xlu0 %68  ;;  %vm91_vm7 = vweird.f32 %v289_v19 }
  0x88   :  { %290 = vrsqrt.f32 %v69_v21  ;;  %vm92_vm9 = vmor %vm90_vm8, %vm91_vm7  ;;  %vm80_vm11 = vweird.f32 %v69_v21  ;;  %vm72_vm14 = vcmp.gt.f32.partialorder %v69_v21, 0.0 }
  0x89   :  { %v86_v22 = vmul.f32 %v289_v19, %v85_v20 }
  0x8b   :  { %v87_v23 = vmul.f32 0.5, %v86_v22 }
  0x8c   :  { %v123_v35 = vpop.f32.mrf.mxu1 }
  0x8d   :  { %v88_v24 = vsub.f32 1.5, %v87_v23 }
  0x8e   :  { %v291_v25 = vpop.eup %290 }
  0x8f   :  { %v75_v27 = vmul.f32 %v291_v25, %v69_v21  ;;  %v89_v29 = vmul.f32 %v289_v19, %v88_v24  ;;  %vm81_vm10 = vweird.f32 %v291_v25  ;;  %v62_v45 = vpop.f32.mrf.mxu0 }
  0x90   :  { %vm82_vm13 = vmor %vm80_vm11, %vm81_vm10 }
  0x91   :  { %v76_v28 = vmul.f32 %v291_v25, %v75_v27  ;;  %v93_v32 = vsel %vm92_vm9, %v289_v19, %v89_v29  ;;  %v234_v29 = vand.u32 127, %v27_v2 }
  0x92   :  { %v95_v34 = vsel %vm73_vm12, %v93_v32, 0.0 }
  0x93   :  { %v77_v30 = vmul.f32 0.5, %v76_v28  ;;  %v127_v39 = vmul.f32 %v123_v35, %v95_v34 }
  0x95   :  { %v78_v31 = vsub.f32 1.5, %v77_v30  ;;  %v65_v47 = vpop.f32.mrf.mxu3  ;;  %v236_v30 = vadd.s32 4294967288, %v234_v29 }
  0x97   :  { %v79_v33 = vmul.f32 %v291_v25, %v78_v31 }
  0x99   :  { %v83_v36 = vsel %vm82_vm13, %v291_v25, %v79_v33 }
  0x9a   :  { %v94_v37 = vsel %vm72_vm14, %v83_v36, 0.0  ;;  %v220_v23 = vpop.permute.xlu0 %219 }
  0x9b   :  { %v126_v38 = vmul.f32 %v121_v26, %v94_v37  ;;  %v221_v24 = vperm.slane %v220_v23, 3 }
  0x9d   :  { %v281_v40 = vpack.i.bf16 %v126_v38, %v127_v39 }
  0x9f   :  { %282 = vrot.lane.b32.xlu1 %v281_v40, %s327_s0 }
  0xa7   :  { %178 = vrot.lane.b32.xlu1 %v176_v42, %s328_s21 }
 0x111   :  { %v283_v43 = vpop.permute.xlu1 %282 }
 0x112   :  { %v284_v44 = vunpack.i.l.bf16 %v283_v43  ;;  %v285_v46 = vunpack.i.h.bf16 %v283_v43 }
 0x114   :  { %157 = vmatpush.msra.mxu2 %v284_v44 }
 0x116   :  { %158 = vmatpush.msra.mxu2 %v285_v46 }
 0x117   :  { %270 = vmatmul.msk.f32.vlgmr.msra.gmra.mxu2 %vm136_vm15, %v62_v45 }
 0x119   :  { %v179_v51 = vpop.permute.xlu1 %178 }
 0x11f   :  { %271 = vmatmul.msk.f32.gmra.mxu2 %vm136_vm15, %v65_v47 }
 0x19a   :  { %v160_v48 = vpop.f32.mrf.mxu2 }
 0x19b   :  { %v166_v49 = vmul.f32 %v160_v48, %v94_v37 }
 0x19d   :  { %v168_v50 = vsub.f32 0.0, %v166_v49 }
 0x19f   :  { %v171_v52 = vadd.f32 %v168_v50, %v121_v26 }
 0x1a1   :  { %v181_v53 = vadd.f32 %v179_v51, %v171_v52  ;;  %v174_v63 = vadd.f32 %v173_v61, %v171_v52 }
 0x1a2   :  { %v163_v54 = vpop.f32.mrf.mxu2 }
 0x1a3   :  { %292 = vtanh.f32 %v181_v53  ;;  %v167_v55 = vmul.f32 %v163_v54, %v95_v34  ;;  %v183_v0 = vmul.f32 0.5, %v174_v63 }
 0x1a5   :  { %v169_v56 = vsub.f32 0.0, %v167_v55 }
 0x1a7   :  { %v172_v57 = vadd.f32 %v169_v56, %v123_v35 }
 0x1a9   :  { %v293_v58 = vpop.eup %292  ;;  %v182_v59 = vadd.f32 %v179_v51, %v172_v57  ;;  %v175_v1 = vadd.f32 %v173_v61, %v172_v57 }
 0x1aa   :  { %197 = vrot.lane.b32.xlu2 %v293_v58, %s329_s3 }
 0x1ab   :  { %294 = vtanh.f32 %v182_v59  ;;  %v184_v3 = vmul.f32 0.5, %v175_v1 }
 0x1ac   :  { %296 = vtanh.f32 %v183_v0 }
 0x1ad   :  { %298 = vtanh.f32 %v184_v3 }
 0x1b1   :  { %v295_v60 = vpop.eup %294 }
 0x1b2   :  { %199 = vrot.lane.b32.xlu2 %v295_v60, %s329_s3  ;;  %v297_v4 = vpop.eup %296 }
 0x1b3   :  { %v187_v5 = vadd.f32 1.0, %v297_v4  ;;  %v299_v7 = vpop.eup %298 }
 0x1b4   :  { %v188_v9 = vadd.f32 1.0, %v299_v7 }
 0x1b5   :  { %v189_v6 = vmul.f32 0.5, %v187_v5 }
 0x1b6   :  { %v190_v14 = vmul.f32 0.5, %v188_v9 }
 0x1b7   :  { %v191_v8 = vsub.f32 1.0, %v189_v6 }
 0x1b8   :  { %v192_v17 = vsub.f32 1.0, %v190_v14 }
 0x204   :  { %v198_v10 = vpop.permute.xlu2 %197 }
 0x205   :  { %v203_v11 = vmul.f32 %v198_v10, %v191_v8 }
 0x207   :  { %v205_v13 = vmax.f32 %v203_v11, 0.0 }
 0x209   :  { %v208_v15 = vmul.f32 %v207_v12, %v205_v13 }
 0x20b   :  { %v211_v16 = vsel %vm210_vm0, %v208_v15, 0.0 }
 0x20c   :  { %212 = vadd.xlane.f32.xlu1 %v211_v16  ;;  %v200_v18 = vpop.permute.xlu2 %199 }
 0x20d   :  { %v204_v19 = vmul.f32 %v200_v18, %v192_v17 }
 0x20f   :  { %v206_v20 = vmax.f32 %v204_v19, 0.0 }
 0x211   :  { %v209_v21 = vmul.f32 %v207_v12, %v206_v20 }
 0x213   :  { %v214_v22 = vsel %vm210_vm0, %v209_v21, 0.0 }
 0x214   :  { %215 = vadd.xlane.f32.xlu2 %v214_v22 }
 0x27f   :  { %v213_v25 = vpop.xlane.xlu1 %212 }
 0x280   :  { %v223_v26 = vadd.f32 %v221_v24, %v213_v25 }
 0x282   :  { %228 = vperm.xlu0 %286, %v223_v26  }
 0x287   :  { %v216_v27 = vpop.xlane.xlu2 %215 }
 0x288   :  { %v224_v28 = vadd.f32 %v221_v24, %v216_v27 }
 0x28a   :  { %231 = vperm.xlu2 %287, %v224_v28  }
 0x2e4   :  { %v232_v31 = vpop.permute.xlu2 %231 }
 0x2e5   :  { %v237_v33 = vperm.slane %v232_v31, %v236_v30 }
 0x2f4   :  { %v229_v32 = vpop.permute.xlu0 %228 }
 0x2f5   :  { %v235_v34 = vperm.slane %v229_v32, %v234_v29 }
 0x2f7   :  { %v239_v35 = vsel %vm238_vm1, %v237_v33, %v235_v34 }
 0x2f8   :  { %242 = vst.msk [vmem:[#allocation2] sm:$0x1] %vm241_vm2, %v239_v35 }
 0x2f9   :  { %253 = dma.vmem_to_hbm [thread:$0]  %s249_s23, 16, %s251_s26, [#allocation3]  }
 0x2fa   :  { %324 = dma.done.wait [#allocation3], 16  }
 0x2fb   :  { %325 = vsyncadd [#allocation3], 4294967280 }
 0x2fc   :  { %258 = vsyncpa [#allocation3], 1 }

</bundles_post_ra>
